<compile_context>
chip_gen: v5e
topology: v5e:2x2
jax: 0.10.0
libtpu: 0.0.40
codegen_flags: <defaults>
</compile_context>

<pallas_src>
import functools

import jax
import jax.numpy as jnp
from jax import lax
from jax.experimental import pallas as pl
from jax.experimental.pallas import tpu as pltpu


def _user_filter_kernel(ids_ref, table_ref, out_ref, *, n_users_pad):
    """One grid step: TB users -> (TB, Ep) filter response via row-select."""
    ids = ids_ref[...]                                        # (TB, 1) int32
    tb = ids.shape[0]
    # Row gather expressed as a one-hot matmul: lane-dense MXU result (N=Ep),
    # exact because each output element is 1.0 * table row element.
    one_hot = (lax.broadcasted_iota(jnp.int32, (tb, n_users_pad), 1)
               == ids).astype(jnp.float32)                    # (TB, n_users_pad)
    out_ref[...] = jnp.dot(one_hot, table_ref[...],
                           preferred_element_type=jnp.float32)  # (TB, Ep)


def _round_up(v, m):
    return ((v + m - 1) // m) * m


def _choose_tb(b_sz, ep, *, min_steps=2, max_tile_elems=2 * 1024 * 1024):
    """Largest 8-aligned batch tile that (a) keeps >= min_steps grid steps when
    the batch allows it (v7x: 2 TensorCores) and (b) keeps the double-buffered
    f32 output tile small vs. the 32 MiB scoped VMEM default (v5e/v6e/v7x)."""
    b_pad8 = _round_up(b_sz, 8)
    tb_cap = max(8, (max_tile_elems // max(ep, 1)) // 8 * 8)   # VMEM budget cap
    tb_target = _round_up(pl.cdiv(b_pad8, min_steps), 8)       # >= min_steps steps
    return max(8, min(tb_cap, tb_target, b_pad8))


def user_specific_filter(eigenvalues, user_ids, params):
    """Pallas wrapper. eigenvalues: (E,) f32, user_ids: (B,) int -> (B, E) f32."""
    emb = params["user_embeddings"].astype(jnp.float32)       # (n_users, P)
    w = params["adapt_w"].astype(jnp.float32)                 # (K+1, P)
    bias = params["adapt_b"].astype(jnp.float32)              # (K+1,)
    base = params["base_coeffs"].astype(jnp.float32)          # (K+1,)
    scale = jnp.asarray(params["adaptation_scale"], jnp.float32)

    n_users = emb.shape[0]
    k1 = base.shape[0]
    e = eigenvalues.shape[0]
    b_sz = user_ids.shape[0]

    # ---- grid-invariant precompute (one-time, plain JAX) ------------------
    # Per-user coefficient table: base + scale * tanh(Linear(embed)).
    adapt = jnp.tanh(emb @ w.T + bias[None, :]) * scale       # (n_users, K+1)
    coeff_table = base[None, :] + adapt                       # (n_users, K+1)

    # Chebyshev filter response per user, same accumulation order as the
    # PyTorch forward, then the exp epilogue — the kernel only selects rows.
    eig = eigenvalues.astype(jnp.float32)
    max_eig = jnp.max(eig) + 1e-8
    x = 2.0 * (eig / max_eig) - 1.0                           # (E,)
    result = coeff_table[:, 0:1] + coeff_table[:, 1:2] * x[None, :]
    t_prev = jnp.ones_like(x)
    t_curr = x
    for i in range(2, k1):
        t_next = 2.0 * x * t_curr - t_prev
        result = result + coeff_table[:, i:i + 1] * t_next[None, :]
        t_prev, t_curr = t_curr, t_next
    out_table = jnp.exp(-jnp.minimum(jnp.abs(result), 10.0)) + 1e-6  # (n_users, E)

    # ---- TPU-friendly padding ---------------------------------------------
    ep = _round_up(e, 128)                       # lane-dense output (unmasked vst)
    n_users_pad = _round_up(n_users, 8)          # sublane-aligned contraction dim
    out_table = jnp.pad(out_table, ((0, n_users_pad - n_users), (0, ep - e)))

    tb = _choose_tb(b_sz, ep)
    b_pad = _round_up(b_sz, tb)
    # Padded batch rows select user 0's row and padded columns are zero; both
    # are sliced off below — never consume the padded buffer directly.
    ids2 = jnp.pad(user_ids.astype(jnp.int32), (0, b_pad - b_sz)).reshape(b_pad, 1)

    kernel = functools.partial(_user_filter_kernel, n_users_pad=n_users_pad)

    out = pl.pallas_call(
        kernel,
        out_shape=jax.ShapeDtypeStruct((b_pad, ep), jnp.float32),
        grid_spec=pltpu.PrefetchScalarGridSpec(
            num_scalar_prefetch=0,
            grid=(b_pad // tb,),
            in_specs=[
                pl.BlockSpec((tb, 1), lambda i: (i, 0)),                 # user_ids
                pl.BlockSpec((n_users_pad, ep), lambda i: (0, 0)),       # fused table
            ],
            out_specs=pl.BlockSpec((tb, ep), lambda i: (i, 0)),
        ),
        compiler_params=pltpu.CompilerParams(
            dimension_semantics=("parallel",)),
    )(ids2, out_table)

    return out[:b_sz, :e]


def reference(eigenvalues, user_ids, params):
    """Pure-JAX reference mirroring the PyTorch forward (coefficients path)."""
    emb = params["user_embeddings"][user_ids]
    adapt = jnp.tanh(emb @ params["adapt_w"].T + params["adapt_b"])
    adapt = adapt * params["adaptation_scale"]
    coeffs = params["base_coeffs"][None, :] + adapt
    max_eig = jnp.max(eigenvalues) + 1e-8
    x = 2.0 * (eigenvalues / max_eig) - 1.0
    result = coeffs[:, 0:1] + coeffs[:, 1:2] * x[None, :]
    t_prev = jnp.ones_like(x)[None, :]
    t_curr = x[None, :]
    for i in range(2, coeffs.shape[1]):
        t_next = 2.0 * x[None, :] * t_curr - t_prev
        result = result + coeffs[:, i:i + 1] * t_next
        t_prev, t_curr = t_curr, t_next
    return jnp.exp(-jnp.minimum(jnp.abs(result), 10.0)) + 1e-6


if __name__ == "__main__":
    # Module hyperparameters (consistent with __init__ defaults)
    n_users = 32
    filter_order = 6            # -> K+1 = 7 coefficients
    personalization_dim = 8
    k1 = filter_order + 1

    # Example input sizes (batch large enough to exercise a 2-step grid)
    batch = 512
    n_eigen = 128               # lane-dense: one vreg wide

    key = jax.random.PRNGKey(0)
    k_emb, k_w, k_b, k_eig, k_ids = jax.random.split(key, 5)

    # Deterministic parameter init mirroring __init__:
    #   nn.init.normal_(user_embeddings.weight, 0, 0.01)
    #   nn.init.xavier_uniform_(adaptation_layer.weight)
    #   adaptation_scale = 0.1
    xavier_lim = (6.0 / (personalization_dim + k1)) ** 0.5
    bias_bound = 1.0 / (personalization_dim ** 0.5)
    params = {
        "user_embeddings": 0.01 * jax.random.normal(
            k_emb, (n_users, personalization_dim), jnp.float32),
        "adapt_w": jax.random.uniform(
            k_w, (k1, personalization_dim), jnp.float32, -xavier_lim, xavier_lim),
        "adapt_b": jax.random.uniform(
            k_b, (k1,), jnp.float32, -bias_bound, bias_bound),
        # deterministic 'smooth' low-pass stand-in for fl.get_filter_coefficients
        "base_coeffs": jnp.array(
            [1.0, -0.5, 0.25, -0.125, 0.0625, -0.03125, 0.015625], jnp.float32),
        "adaptation_scale": jnp.float32(0.1),
    }

    eigenvalues = jax.random.uniform(k_eig, (n_eigen,), jnp.float32, 0.0, 2.0)
    user_ids = jax.random.randint(k_ids, (batch,), 0, n_users, jnp.int32)

    out = user_specific_filter(eigenvalues, user_ids, params)
    out = jax.block_until_ready(out)

    ref = reference(eigenvalues, user_ids, params)
    assert out.shape == (batch, n_eigen)
    assert jnp.allclose(out, ref, atol=1e-4, rtol=1e-4), "mismatch vs reference"

    print("KERNEL_OK")
</pallas_src>

<mosaic_0001>
module attributes {stable_mosaic.version = 11 : i64} {
  func.func @_user_filter_kernel(%arg0: i32, %arg1: memref<256x1xi32, #tpu.memory_space<vmem>>, %arg2: memref<32x128xf32, #tpu.memory_space<vmem>>, %arg3: memref<256x128xf32, #tpu.memory_space<vmem>>) attributes {dimension_semantics = [#tpu.dimension_semantics<parallel>], iteration_bounds = array<i64: 2>, scalar_prefetch = 0 : i64, scratch_operands = 0 : i64, tpu.core_type = #tpu.core_type<tc>, window_params = [{transform_indices = @transform_0, window_bounds = array<i64: 256, 1>}, {pipeline_mode = #tpu.pipeline_mode<synchronous>, transform_indices = @transform_1, window_bounds = array<i64: 32, 128>}, {transform_indices = @transform_2, window_bounds = array<i64: 256, 128>}]} {
    %c0 = arith.constant 0 : index
    %c0_0 = arith.constant 0 : index
    %0 = vector.load %arg1[%c0, %c0_0] : memref<256x1xi32, #tpu.memory_space<vmem>>, vector<256x1xi32>
    %1 = tpu.iota {dimensions = array<i32: 1>} : vector<256x32xi32>
    %2 = vector.broadcast %0 : vector<256x1xi32> to vector<256x32xi32>
    %3 = arith.cmpi eq, %1, %2 : vector<256x32xi32>
    %4 = arith.extui %3 : vector<256x32xi1> to vector<256x32xi32>
    %5 = arith.sitofp %4 : vector<256x32xi32> to vector<256x32xf32>
    %c0_1 = arith.constant 0 : index
    %c0_2 = arith.constant 0 : index
    %6 = vector.load %arg2[%c0_1, %c0_2] : memref<32x128xf32, #tpu.memory_space<vmem>>, vector<32x128xf32>
    %cst = arith.constant dense<0.000000e+00> : vector<256x128xf32>
    %7 = tpu.matmul %5, %6, %cst {dimension_numbers = #tpu.dot_dimension_numbers<[1], [0], [0], [1], [0, 0, 1, 1], [], []>} : vector<256x32xf32>, vector<32x128xf32>, vector<256x128xf32> -> vector<256x128xf32>
    %c0_3 = arith.constant 0 : index
    %c0_4 = arith.constant 0 : index
    %8 = vector.load %arg3[%c0_3, %c0_4] : memref<256x128xf32, #tpu.memory_space<vmem>>, vector<256x128xf32>
    tpu.vector_store %arg3[%c0_3, %c0_4], %7 {strides = array<i32>} : memref<256x128xf32, #tpu.memory_space<vmem>>, vector<256x128xf32>,
    return
  }
  func.func @transform_0(%arg0: i32) -> (i32, i32) {
    %c0_i32 = arith.constant 0 : i32
    %c0_i32_0 = arith.constant 0 : i32
    return %arg0, %c0_i32 : i32, i32
  }
  func.func @transform_1(%arg0: i32) -> (i32, i32) {
    %c0_i32 = arith.constant 0 : i32
    %c0_i32_0 = arith.constant 0 : i32
    %c0_i32_1 = arith.constant 0 : i32
    return %c0_i32, %c0_i32_0 : i32, i32
  }
  func.func @transform_2(%arg0: i32) -> (i32, i32) {
    %c0_i32 = arith.constant 0 : i32
    %c0_i32_0 = arith.constant 0 : i32
    return %arg0, %c0_i32 : i32, i32
  }
}

</mosaic_0001>

<bundles_post_ra>
// kernel: tpu_custom_call.1
= control target key start
LH: loop header
LB: loop body
LE: loop exit
PB: predicated region body
PF: predicated region fallthrough
CT: control target
= control target key end

     0   :  { %7 = vsyncpa [#allocation3], 0  ;;  %s1180_s0 = inlined_call_operand.vmem [shape: s32[512,1], index: 0, kind: input, shape index: {}]   ;;  %s1181_s1 = inlined_call_operand.vmem [shape: f32[32,128], index: 1, kind: input, shape index: {}]   ;;  %s1182_s2 = inlined_call_operand.hbm [shape: f32[512,128], index: 2, kind: output, shape index: {}]  }
   0x1   :  { %9 = vsyncpa [#allocation3 + $0x1], 0  ;;  %s913_s9 = smov 0   ;;  %s915_s10 = smov 0  }
   0x2   :  { %s917_s11 = smov 0   ;;  %s919_s12 = smov 0  }
   0x3 LB: > { %s934_s13 = sadd.s32 4294967295, %s892_s12   ;;  %s695_s14 = sadd.s32 4294967294, %s892_s12   ;;  %s892_s12 = sphi %s919_s12, %s1188_s12   ;;  %s888_s11 = sphi %s917_s11, %s1187_s11   ;;  %s884_s10 = sphi %s915_s10, %s1186_s10   ;;  %s880_s9 = sphi %s913_s9, %s1185_s9  }
   0x4   : > { %s938_s15 = sadd.s32 1, %s892_s12   ;;  %s69_s16 = sadd.s32 1, %s888_s11 }
   0x5   : > { %s66_s17 = ssub.s32 %s892_s12, %s938_s15  ;;  %p79_p0 = scmp.ne.s32.totalorder %s888_s11, %s884_s10 }
   0x6   : > { %p67_p1 = scmp.eq.s32.totalorder %s66_s17, 0  ;;  %p80_p2 = scmp.eq.s32.totalorder %s934_s13, 1 }
   0x7   : > { %p85_p3 = scmp.ne.s32.totalorder %s884_s10, %s880_s9  ;;  %p86_p4 = scmp.eq.s32.totalorder %s695_s14, 1 }
   0x8   : > { %s949_s18 = scalar_select %p67_p1, %s888_s11, %s69_s16  }
   0x9   : > { %p951_p5 = por %p80_p2, %p79_p0  ;;  %p955_p6 = por %p86_p4, %p85_p3 }
   0xa   : > { %p698_p7 = scmp.ge.s32.totalorder %s892_s12, 1  ;;  %p116_p8 = scmp.lt.s32.totalorder %s892_s12, 3 }
   0xc   : > { %p117_p9 = pnand %p698_p7, %p116_p8 }
   0xd   : > { %s700_s21 = sshll.u32 (!%p117_p9), %s934_s13, 5  ;;  %s135_s6 = sand.u32 (!%p117_p9), 1, %s884_s10  }
   0xe   : > { %120 = sbr.rel (%p117_p9) target bundleno = 352 (0x160), region = 28  ;;  %p139_p10 = scmp.lt.s32.totalorder (!%p117_p9), %s700_s21, 63 }
   0xf   : > { %s699_s7 = sshll.u32 (!%p117_p9), %s135_s6, 8  ;;  %s771_s14 = sshll.u32 (!%p117_p9), %s934_s13, 8 }
  0x10   : > { %s1112_s8 = scalar_lea.vmem (!%p117_p9), [#allocation2], %s699_s7  ;;  %s618_s13 = scalar_lea.sflag (!%p117_p9), [#allocation3], %s135_s6 }
  0x11   : > { %s850_s28 = scalar_lea.hbm (!%p117_p9), %s1182_s2, 512 }
  0x13   : > { %v894_v0 = vmov 0   ;;  %s1190_s21 = smov (!%p139_p10, %s700_s21), 63  ;;  %v374_v31 = vld [vmem:[%s1181_s1 + $0x18] sm:$0xff]  ;;  %v373_v32 = vld [vmem:[%s1181_s1 + $0x10] sm:$0xff]  ;;  %v372_v35 = vld [vmem:[%s1181_s1 + $0x8] sm:$0xff]  ;;  %v177_v39 = vlaneseq  ;;  %vm375_vm0 = vcmask 261120  }
  0x14   : > { %829 = vset.pattern.permute.xlu2 %v894_v0  ;;  %828 = vset.pattern.permute.xlu1 %v894_v0  ;;  %s701_s22 = sshll.u32 %s1190_s21, 3  ;;  %v371_v36 = vld [vmem:[%s1181_s1] sm:$0xff]  ;;  %v895_v44 = vmov 0.0   ;;  %s629_s21 = scalar_lea.hbm %s1182_s2, %s771_s14 }
  0x15   : > { %827 = vset.pattern.permute.xlu0 %v894_v0  ;;  %s965_s25 = scalar_lea.vmem %s1180_s0, %s701_s22  ;;  %484 = vmatpush.msra.mxu0 %v374_v31  ;;  %v1011_v40 = vand.u32 127, %v177_v39  ;;  %s630_s22 = sshll.u32 %s1112_s8, 4  ;;  %s631_s22 = int_to_ptr.vmem [resolvable:$true] %s630_s22 }
  0x16   : > { %v162_v1 = vld [vmem:[%s965_s25 + $0x88] sm:$0xff]  ;;  %v161_v2 = vld [vmem:[%s965_s25 + $0x80] sm:$0xff]  ;;  %v163_v7 = vld [vmem:[%s965_s25 + $0x90] sm:$0xff]  ;;  %773 = vmatpush.msra.mxu2 %v374_v31  ;;  %772 = vmatpush.msra.mxu1 %v374_v31  ;;  %s632_s23 = sshll.u32 %s629_s21, 4  ;;  %s633_s23 = int_to_ptr.hbm [resolvable:$true] %s632_s23 }
  0x17   : > { %v145_v3 = vld [vmem:[%s965_s25] sm:$0xff]  ;;  %231 = vperm.xlu2 %829, %v162_v1   ;;  %228 = vperm.xlu0 %827, %v161_v2   ;;  %v170_v4 = vld [vmem:[%s965_s25 + $0xc8] sm:$0xff]  ;;  %v155_v10 = vld [vmem:[%s965_s25 + $0x50] sm:$0xff]  ;;  %s844_s24 = sshra.s32 %s633_s23, 4  ;;  %s845_s24 = int_to_ptr.hbm [resolvable:$true] %s844_s24 }
  0x18   : > { %180 = vperm.xlu1 %828, %v145_v3   ;;  %v169_v5 = vld [vmem:[%s965_s25 + $0xc0] sm:$0xff]  ;;  %v146_v8 = vld [vmem:[%s965_s25 + $0x8] sm:$0xff]  ;;  %v171_v11 = vld [vmem:[%s965_s25 + $0xd0] sm:$0xff]  ;;  %774 = vmatpush.msra.mxu3 %v374_v31  ;;  %p851_p0 = scmp.lt.s32.totalorder %s845_s24, %s1182_s2 }
  0x19   : > { %v153_v6 = vld [vmem:[%s965_s25 + $0x40] sm:$0xff]  ;;  %v154_v9 = vld [vmem:[%s965_s25 + $0x48] sm:$0xff]  ;;  %v147_v12 = vld [vmem:[%s965_s25 + $0x10] sm:$0xff]  ;;  %485 = vmatpush.msra.mxu0 %v373_v32  ;;  %776 = vmatpush.msra.mxu2 %v373_v32 }
  0x1a   : > { %v148_v13 = vld [vmem:[%s965_s25 + $0x18] sm:$0xff]  ;;  %v173_v16 = vld [vmem:[%s965_s25 + $0xe0] sm:$0xff]  ;;  %v166_v19 = vld [vmem:[%s965_s25 + $0xa8] sm:$0xff]  ;;  %775 = vmatpush.msra.mxu1 %v373_v32  ;;  %777 = vmatpush.msra.mxu3 %v373_v32 }
  0x1b   : > { %v164_v14 = vld [vmem:[%s965_s25 + $0x98] sm:$0xff]  ;;  %v165_v18 = vld [vmem:[%s965_s25 + $0xa0] sm:$0xff]  ;;  %v158_v22 = vld [vmem:[%s965_s25 + $0x68] sm:$0xff]  ;;  %486 = vmatpush.msra.mxu0 %v372_v35  ;;  %779 = vmatpush.msra.mxu2 %v372_v35 }
  0x1c   : > { %v172_v15 = vld [vmem:[%s965_s25 + $0xd8] sm:$0xff]  ;;  %v149_v20 = vld [vmem:[%s965_s25 + $0x20] sm:$0xff]  ;;  %v174_v23 = vld [vmem:[%s965_s25 + $0xe8] sm:$0xff]  ;;  %778 = vmatpush.msra.mxu1 %v372_v35  ;;  %780 = vmatpush.msra.mxu3 %v372_v35 }
  0x1d   : > { %v156_v17 = vld [vmem:[%s965_s25 + $0x58] sm:$0xff]  ;;  %v157_v21 = vld [vmem:[%s965_s25 + $0x60] sm:$0xff]  ;;  %v150_v24 = vld [vmem:[%s965_s25 + $0x28] sm:$0xff]  ;;  %487 = vmatpush.msra.mxu0 %v371_v36  ;;  %782 = vmatpush.msra.mxu2 %v371_v36 }
  0x1e   : > { %v151_v25 = vld [vmem:[%s965_s25 + $0x30] sm:$0xff]  ;;  %v176_v28 = vld [vmem:[%s965_s25 + $0xf8] sm:$0xff]  ;;  %781 = vmatpush.msra.mxu1 %v371_v36  ;;  %783 = vmatpush.msra.mxu3 %v371_v36 }
  0x1f   : > { %255 = vperm.xlu2 %829, %v170_v4   ;;  %252 = vperm.xlu0 %827, %v169_v5   ;;  %v167_v26 = vld [vmem:[%s965_s25 + $0xb0] sm:$0xff]  ;;  %v168_v30 = vld [vmem:[%s965_s25 + $0xb8] sm:$0xff] }
  0x20   : > { %204 = vperm.xlu1 %828, %v153_v6   ;;  %v175_v27 = vld [vmem:[%s965_s25 + $0xf0] sm:$0xff]  ;;  %v152_v33 = vld [vmem:[%s965_s25 + $0x38] sm:$0xff] }
  0x21   : > { %v159_v29 = vld [vmem:[%s965_s25 + $0x70] sm:$0xff]  ;;  %v160_v34 = vld [vmem:[%s965_s25 + $0x78] sm:$0xff]  ;;  %s846_s25 = scalar_lea.hbm %s845_s24, 256 }
  0x22   : > { %p847_p11 = scmp.ne.s32.totalorder %s845_s24, %s846_s25  ;;  %p852_p1 = scmp.lt.s32.totalorder %s850_s28, %s846_s25 }
  0x24   : > { %p848_p12 = pnand %p847_p11, %p951_p5  ;;  %p853_p2 = por %p852_p1, %p851_p0 }
  0x26   : > { %p849_p13 = pneg %p848_p12 }
  0x27   : > { %234 = vperm.xlu2 %829, %v163_v7   ;;  %183 = vperm.xlu0 %827, %v146_v8  }
  0x28   : > { %207 = vperm.xlu1 %828, %v154_v9   ;;  %p854_p3 = pnand %p853_p2, %p849_p13 }
  0x2f   : > { %210 = vperm.xlu2 %829, %v155_v10   ;;  %258 = vperm.xlu0 %827, %v171_v11  }
  0x30   : > { %186 = vperm.xlu1 %828, %v147_v12  }
  0x37   : > { %189 = vperm.xlu2 %829, %v148_v13   ;;  %237 = vperm.xlu0 %827, %v164_v14  }
  0x38   : > { %261 = vperm.xlu1 %828, %v172_v15  }
  0x3f   : > { %264 = vperm.xlu2 %829, %v173_v16   ;;  %213 = vperm.xlu0 %827, %v156_v17  }
  0x40   : > { %240 = vperm.xlu1 %828, %v165_v18  }
  0x47   : > { %243 = vperm.xlu2 %829, %v166_v19   ;;  %192 = vperm.xlu0 %827, %v149_v20  }
  0x48   : > { %216 = vperm.xlu1 %828, %v157_v21  }
  0x4f   : > { %219 = vperm.xlu2 %829, %v158_v22   ;;  %267 = vperm.xlu0 %827, %v174_v23  }
  0x50   : > { %195 = vperm.xlu1 %828, %v150_v24  }
  0x57   : > { %198 = vperm.xlu2 %829, %v151_v25   ;;  %246 = vperm.xlu0 %827, %v167_v26  }
  0x58   : > { %270 = vperm.xlu1 %828, %v175_v27  }
  0x5f   : > { %273 = vperm.xlu2 %829, %v176_v28   ;;  %222 = vperm.xlu0 %827, %v159_v29  }
  0x60   : > { %249 = vperm.xlu1 %828, %v168_v30  }
  0x67   : > { %201 = vperm.xlu0 %827, %v152_v33  }
  0x68   : > { %225 = vperm.xlu1 %828, %v160_v34  }
  0x71   : > { %v232_v37 = vpop.permute.xlu2 %231 }
  0x72   : > { %vm292_vm3 = vcmp.eq.s32.totalorder %v1011_v40, %v232_v37 }
  0x73   : > { %v719_v50 = vsel %vm292_vm3, 1.0, %v895_v44 }
  0x79   : > { %v256_v38 = vpop.permute.xlu2 %255 }
  0x7a   : > { %vm300_vm7 = vcmp.eq.s32.totalorder %v1011_v40, %v256_v38 }
  0x7b   : > { %v727_v57 = vsel %vm300_vm7, 1.0, %v895_v44 }
  0x81   : > { %v235_v41 = vpop.permute.xlu2 %234 }
  0x82   : > { %vm293_vm6 = vcmp.eq.s32.totalorder %v1011_v40, %v235_v41 }
  0x83   : > { %v720_v55 = vsel %vm293_vm6, 1.0, %v895_v44 }
  0x89   : > { %v229_v42 = vpop.permute.xlu0 %228  ;;  %v211_v48 = vpop.permute.xlu2 %210 }
  0x8a   : > { %vm291_vm1 = vcmp.eq.s32.totalorder %v1011_v40, %v229_v42  ;;  %v181_v43 = vpop.permute.xlu1 %180  ;;  %vm285_vm10 = vcmp.eq.s32.totalorder %v1011_v40, %v211_v48 }
  0x8b   : > { %v718_v45 = vsel %vm291_vm1, 1.0, %v895_v44  ;;  %vm275_vm2 = vcmp.eq.s32.totalorder %v1011_v40, %v181_v43  ;;  %v712_v63 = vsel %vm285_vm10, 1.0, %v895_v44 }
  0x8c   : > { %v702_v46 = vsel %vm275_vm2, 1.0, %v895_v44  ;;  %750 = vmatmul.msk.f32.vlgmr.msra.gmra.mxu2 %vm375_vm0, %v718_v45 }
  0x8d   : > { %734 = vmatmul.msk.f32.vlgmr.msra.gmra.mxu0 %vm375_vm0, %v702_v46 }
  0x91   : > { %v253_v47 = vpop.permute.xlu0 %252  ;;  %v190_v58 = vpop.permute.xlu2 %189 }
  0x92   : > { %vm299_vm4 = vcmp.eq.s32.totalorder %v1011_v40, %v253_v47  ;;  %v205_v49 = vpop.permute.xlu1 %204  ;;  %vm278_vm13 = vcmp.eq.s32.totalorder %v1011_v40, %v190_v58 }
  0x93   : > { %v726_v51 = vsel %vm299_vm4, 1.0, %v895_v44  ;;  %vm283_vm5 = vcmp.eq.s32.totalorder %v1011_v40, %v205_v49  ;;  %v705_v5 = vsel %vm278_vm13, 1.0, %v895_v44 }
  0x94   : > { %v710_v52 = vsel %vm283_vm5, 1.0, %v895_v44  ;;  %751 = vmatmul.msk.f32.gmra.mxu2 %vm375_vm0, %v719_v50  ;;  %758 = vmatmul.msk.f32.vlgmr.msra.gmra.mxu3 %vm375_vm0, %v726_v51 }
  0x95   : > { %742 = vmatmul.msk.f32.vlgmr.msra.gmra.mxu1 %vm375_vm0, %v710_v52 }
  0x99   : > { %v184_v53 = vpop.permute.xlu0 %183  ;;  %v265_v1 = vpop.permute.xlu2 %264 }
  0x9a   : > { %vm276_vm8 = vcmp.eq.s32.totalorder %v1011_v40, %v184_v53  ;;  %v208_v54 = vpop.permute.xlu1 %207  ;;  %vm303_vm1 = vcmp.eq.s32.totalorder %v1011_v40, %v265_v1 }
  0x9b   : > { %v703_v56 = vsel %vm276_vm8, 1.0, %v895_v44  ;;  %vm284_vm9 = vcmp.eq.s32.totalorder %v1011_v40, %v208_v54  ;;  %v730_v12 = vsel %vm303_vm1, 1.0, %v895_v44 }
  0x9c   : > { %v711_v59 = vsel %vm284_vm9, 1.0, %v895_v44  ;;  %735 = vmatmul.msk.f32.gmra.mxu0 %vm375_vm0, %v703_v56  ;;  %752 = vmatmul.msk.f32.gmra.mxu2 %vm375_vm0, %v720_v55 }
  0x9d   : > { %743 = vmatmul.msk.f32.gmra.mxu1 %vm375_vm0, %v711_v59  ;;  %759 = vmatmul.msk.f32.gmra.mxu3 %vm375_vm0, %v727_v57 }
  0xa1   : > { %v259_v60 = vpop.permute.xlu0 %258  ;;  %v244_v7 = vpop.permute.xlu2 %243 }
  0xa2   : > { %vm301_vm11 = vcmp.eq.s32.totalorder %v1011_v40, %v259_v60  ;;  %v187_v61 = vpop.permute.xlu1 %186  ;;  %vm296_vm4 = vcmp.eq.s32.totalorder %v1011_v40, %v244_v7 }
  0xa3   : > { %v728_v62 = vsel %vm301_vm11, 1.0, %v895_v44  ;;  %vm277_vm12 = vcmp.eq.s32.totalorder %v1011_v40, %v187_v61  ;;  %v723_v17 = vsel %vm296_vm4, 1.0, %v895_v44 }
  0xa4   : > { %v704_v0 = vsel %vm277_vm12, 1.0, %v895_v44 }
  0xa5   : > { %736 = vmatmul.msk.f32.gmra.mxu0 %vm375_vm0, %v704_v0  ;;  %744 = vmatmul.msk.f32.gmra.mxu1 %vm375_vm0, %v712_v63 }
  0xa6   : > { %760 = vmatmul.msk.f32.gmra.mxu3 %vm375_vm0, %v728_v62 }
  0xa9   : > { %v238_v2 = vpop.permute.xlu0 %237  ;;  %v220_v14 = vpop.permute.xlu2 %219 }
  0xaa   : > { %vm294_vm14 = vcmp.eq.s32.totalorder %v1011_v40, %v238_v2  ;;  %v262_v3 = vpop.permute.xlu1 %261  ;;  %vm288_vm7 = vcmp.eq.s32.totalorder %v1011_v40, %v220_v14 }
  0xab   : > { %v721_v4 = vsel %vm294_vm14, 1.0, %v895_v44  ;;  %vm302_vm15 = vcmp.eq.s32.totalorder %v1011_v40, %v262_v3  ;;  %v715_v22 = vsel %vm288_vm7, 1.0, %v895_v44 }
  0xac   : > { %v729_v6 = vsel %vm302_vm15, 1.0, %v895_v44  ;;  %753 = vmatmul.msk.f32.gmra.mxu2 %vm375_vm0, %v721_v4 }
  0xad   : > { %737 = vmatmul.msk.f32.gmra.mxu0 %vm375_vm0, %v705_v5 }
  0xae   : > { %761 = vmatmul.msk.f32.gmra.mxu3 %vm375_vm0, %v729_v6 }
  0xb1   : > { %v214_v8 = vpop.permute.xlu0 %213  ;;  %v199_v23 = vpop.permute.xlu2 %198 }
  0xb2   : > { %vm286_vm2 = vcmp.eq.s32.totalorder %v1011_v40, %v214_v8  ;;  %v241_v9 = vpop.permute.xlu1 %240  ;;  %vm281_vm10 = vcmp.eq.s32.totalorder %v1011_v40, %v199_v23 }
  0xb3   : > { %v713_v10 = vsel %vm286_vm2, 1.0, %v895_v44  ;;  %vm295_vm3 = vcmp.eq.s32.totalorder %v1011_v40, %v241_v9  ;;  %v708_v28 = vsel %vm281_vm10, 1.0, %v895_v44 }
  0xb4   : > { %v722_v11 = vsel %vm295_vm3, 1.0, %v895_v44  ;;  %745 = vmatmul.msk.f32.gmra.mxu1 %vm375_vm0, %v713_v10 }
  0xb5   : > { %754 = vmatmul.msk.f32.gmra.mxu2 %vm375_vm0, %v722_v11 }
  0xb6   : > { %762 = vmatmul.msk.f32.gmra.mxu3 %vm375_vm0, %v730_v12 }
  0xb9   : > { %v193_v13 = vpop.permute.xlu0 %192  ;;  %v274_v30 = vpop.permute.xlu2 %273 }
  0xba   : > { %vm279_vm5 = vcmp.eq.s32.totalorder %v1011_v40, %v193_v13  ;;  %v217_v15 = vpop.permute.xlu1 %216  ;;  %vm306_vm13 = vcmp.eq.s32.totalorder %v1011_v40, %v274_v30 }
  0xbb   : > { %v706_v16 = vsel %vm279_vm5, 1.0, %v895_v44  ;;  %vm287_vm6 = vcmp.eq.s32.totalorder %v1011_v40, %v217_v15  ;;  %v733_v34 = vsel %vm306_vm13, 1.0, %v895_v44 }
  0xbc   : > { %v714_v18 = vsel %vm287_vm6, 1.0, %v895_v44  ;;  %738 = vmatmul.msk.f32.gmra.mxu0 %vm375_vm0, %v706_v16 }
  0xbd   : > { %746 = vmatmul.msk.f32.gmra.mxu1 %vm375_vm0, %v714_v18  ;;  %755 = vmatmul.msk.f32.gmra.mxu2 %vm375_vm0, %v723_v17 }
  0xc1   : > { %v268_v19 = vpop.permute.xlu0 %267 }
  0xc2   : > { %vm304_vm8 = vcmp.eq.s32.totalorder %v1011_v40, %v268_v19  ;;  %v196_v20 = vpop.permute.xlu1 %195 }
  0xc3   : > { %v731_v21 = vsel %vm304_vm8, 1.0, %v895_v44  ;;  %vm280_vm9 = vcmp.eq.s32.totalorder %v1011_v40, %v196_v20 }
  0xc4   : > { %v707_v24 = vsel %vm280_vm9, 1.0, %v895_v44  ;;  %763 = vmatmul.msk.f32.gmra.mxu3 %vm375_vm0, %v731_v21 }
  0xc5   : > { %739 = vmatmul.msk.f32.gmra.mxu0 %vm375_vm0, %v707_v24  ;;  %747 = vmatmul.msk.f32.gmra.mxu1 %vm375_vm0, %v715_v22 }
  0xc9   : > { %v247_v25 = vpop.permute.xlu0 %246 }
  0xca   : > { %vm297_vm11 = vcmp.eq.s32.totalorder %v1011_v40, %v247_v25  ;;  %v271_v26 = vpop.permute.xlu1 %270 }
  0xcb   : > { %v724_v27 = vsel %vm297_vm11, 1.0, %v895_v44  ;;  %vm305_vm12 = vcmp.eq.s32.totalorder %v1011_v40, %v271_v26 }
  0xcc   : > { %v732_v29 = vsel %vm305_vm12, 1.0, %v895_v44  ;;  %756 = vmatmul.msk.f32.gmra.mxu2 %vm375_vm0, %v724_v27 }
  0xcd   : > { %740 = vmatmul.msk.f32.gmra.mxu0 %vm375_vm0, %v708_v28  ;;  %764 = vmatmul.msk.f32.gmra.mxu3 %vm375_vm0, %v732_v29 }
  0xd1   : > { %v223_v31 = vpop.permute.xlu0 %222 }
  0xd2   : > { %vm289_vm14 = vcmp.eq.s32.totalorder %v1011_v40, %v223_v31  ;;  %v250_v32 = vpop.permute.xlu1 %249 }
  0xd3   : > { %v716_v33 = vsel %vm289_vm14, 1.0, %v895_v44  ;;  %vm298_vm15 = vcmp.eq.s32.totalorder %v1011_v40, %v250_v32 }
  0xd4   : > { %v725_v35 = vsel %vm298_vm15, 1.0, %v895_v44  ;;  %748 = vmatmul.msk.f32.gmra.mxu1 %vm375_vm0, %v716_v33 }
  0xd5   : > { %757 = vmatmul.msk.f32.gmra.mxu2 %vm375_vm0, %v725_v35  ;;  %765 = vmatmul.msk.f32.gmra.mxu3 %vm375_vm0, %v733_v34 }
  0xd9   : > { %v202_v36 = vpop.permute.xlu0 %201 }
  0xda   : > { %vm282_vm1 = vcmp.eq.s32.totalorder %v1011_v40, %v202_v36  ;;  %v226_v37 = vpop.permute.xlu1 %225 }
  0xdb   : > { %v709_v38 = vsel %vm282_vm1, 1.0, %v895_v44  ;;  %vm290_vm2 = vcmp.eq.s32.totalorder %v1011_v40, %v226_v37 }
  0xdc   : > { %v717_v39 = vsel %vm290_vm2, 1.0, %v895_v44  ;;  %741 = vmatmul.msk.f32.gmra.mxu0 %vm375_vm0, %v709_v38 }
  0xdd   : > { %749 = vmatmul.msk.f32.gmra.mxu1 %vm375_vm0, %v717_v39 }
 0x10a   : > { %v489_v41 = vpop.f32.mrf.mxu0 }
 0x10b   : > { %585 = vst [vmem:[%s1112_s8] sm:$0xff] %v489_v41 }
 0x10f   : > { %v537_v40 = vpop.f32.mrf.mxu2 }
 0x110   : > { %601 = vst [vmem:[%s1112_s8 + $0x80] sm:$0xff] %v537_v40 }
 0x112   : > { %v513_v42 = vpop.f32.mrf.mxu1 }
 0x113   : > { %593 = vst [vmem:[%s1112_s8 + $0x40] sm:$0xff] %v513_v42 }
 0x117   : > { %v540_v43 = vpop.f32.mrf.mxu2  ;;  %v561_v44 = vpop.f32.mrf.mxu3 }
 0x118   : > { %602 = vst [vmem:[%s1112_s8 + $0x88] sm:$0xff] %v540_v43 }
 0x119   : > { %609 = vst [vmem:[%s1112_s8 + $0xc0] sm:$0xff] %v561_v44  ;;  %v492_v45 = vpop.f32.mrf.mxu0 }
 0x11a   : > { %586 = vst [vmem:[%s1112_s8 + $0x8] sm:$0xff] %v492_v45  ;;  %v516_v46 = vpop.f32.mrf.mxu1 }
 0x11b   : > { %594 = vst [vmem:[%s1112_s8 + $0x48] sm:$0xff] %v516_v46 }
 0x11f   : > { %v543_v47 = vpop.f32.mrf.mxu2 }
 0x120   : > { %603 = vst [vmem:[%s1112_s8 + $0x90] sm:$0xff] %v543_v47  ;;  %v564_v48 = vpop.f32.mrf.mxu3 }
 0x121   : > { %610 = vst [vmem:[%s1112_s8 + $0xc8] sm:$0xff] %v564_v48 }
 0x122   : > { %v495_v49 = vpop.f32.mrf.mxu0  ;;  %v519_v50 = vpop.f32.mrf.mxu1 }
 0x123   : > { %587 = vst [vmem:[%s1112_s8 + $0x10] sm:$0xff] %v495_v49 }
 0x124   : > { %595 = vst [vmem:[%s1112_s8 + $0x50] sm:$0xff] %v519_v50 }
 0x129   : > { %v567_v51 = vpop.f32.mrf.mxu3 }
 0x12a   : > { %611 = vst [vmem:[%s1112_s8 + $0xd0] sm:$0xff] %v567_v51  ;;  %v498_v52 = vpop.f32.mrf.mxu0 }
 0x12b   : > { %588 = vst [vmem:[%s1112_s8 + $0x18] sm:$0xff] %v498_v52 }
 0x12f   : > { %v546_v53 = vpop.f32.mrf.mxu2 }
 0x130   : > { %604 = vst [vmem:[%s1112_s8 + $0x98] sm:$0xff] %v546_v53 }
 0x131   : > { %v570_v54 = vpop.f32.mrf.mxu3  ;;  %v522_v55 = vpop.f32.mrf.mxu1 }
 0x132   : > { %612 = vst [vmem:[%s1112_s8 + $0xd8] sm:$0xff] %v570_v54 }
 0x133   : > { %596 = vst [vmem:[%s1112_s8 + $0x58] sm:$0xff] %v522_v55 }
 0x138   : > { %v549_v56 = vpop.f32.mrf.mxu2 }
 0x139   : > { %605 = vst [vmem:[%s1112_s8 + $0xa0] sm:$0xff] %v549_v56  ;;  %v573_v57 = vpop.f32.mrf.mxu3  ;;  %v501_v58 = vpop.f32.mrf.mxu0 }
 0x13a   : > { %613 = vst [vmem:[%s1112_s8 + $0xe0] sm:$0xff] %v573_v57  ;;  %v525_v59 = vpop.f32.mrf.mxu1 }
 0x13b   : > { %589 = vst [vmem:[%s1112_s8 + $0x20] sm:$0xff] %v501_v58 }
 0x13c   : > { %597 = vst [vmem:[%s1112_s8 + $0x60] sm:$0xff] %v525_v59 }
 0x140   : > { %v552_v60 = vpop.f32.mrf.mxu2 }
 0x141   : > { %606 = vst [vmem:[%s1112_s8 + $0xa8] sm:$0xff] %v552_v60 }
 0x142   : > { %v504_v61 = vpop.f32.mrf.mxu0  ;;  %v528_v62 = vpop.f32.mrf.mxu1 }
 0x143   : > { %590 = vst [vmem:[%s1112_s8 + $0x28] sm:$0xff] %v504_v61 }
 0x144   : > { %598 = vst [vmem:[%s1112_s8 + $0x68] sm:$0xff] %v528_v62 }
 0x147   : > { %v576_v63 = vpop.f32.mrf.mxu3 }
 0x148   : > { %614 = vst [vmem:[%s1112_s8 + $0xe8] sm:$0xff] %v576_v63 }
 0x14a   : > { %v507_v0 = vpop.f32.mrf.mxu0 }
 0x14b   : > { %591 = vst [vmem:[%s1112_s8 + $0x30] sm:$0xff] %v507_v0 }
 0x14f   : > { %v555_v1 = vpop.f32.mrf.mxu2 }
 0x150   : > { %607 = vst [vmem:[%s1112_s8 + $0xb0] sm:$0xff] %v555_v1  ;;  %v579_v2 = vpop.f32.mrf.mxu3 }
 0x151   : > { %615 = vst [vmem:[%s1112_s8 + $0xf0] sm:$0xff] %v579_v2  ;;  %v531_v3 = vpop.f32.mrf.mxu1 }
 0x152   : > { %599 = vst [vmem:[%s1112_s8 + $0x70] sm:$0xff] %v531_v3 }
 0x158   : > { %v558_v4 = vpop.f32.mrf.mxu2  ;;  %v582_v5 = vpop.f32.mrf.mxu3 }
 0x159   : > { %608 = vst [vmem:[%s1112_s8 + $0xb8] sm:$0xff] %v558_v4  ;;  %v510_v6 = vpop.f32.mrf.mxu0 }
 0x15a   : > { %616 = vst [vmem:[%s1112_s8 + $0xf8] sm:$0xff] %v582_v5  ;;  %v534_v7 = vpop.f32.mrf.mxu1 }
 0x15b   : > { %592 = vst [vmem:[%s1112_s8 + $0x38] sm:$0xff] %v510_v6 }
 0x15c   : > { %600 = vst [vmem:[%s1112_s8 + $0x78] sm:$0xff] %v534_v7 }
 0x15d   : > { %857 = shalt.err (!%p854_p3)
}
 0x15e   : > { %s896_s3 = smov 128   ;;  %s897_s4 = smov 8  }
 0x15f   : > { %784 = dma.vmem_to_hbm [thread:$0]  (%p951_p5), %s631_s22, 4096, %s633_s23, %s618_s13, %s896_s3, %s896_s3, %s897_s4  }
 0x160 PF: > { %p790_p4 = scmp.ge.s32.totalorder %s892_s12, 2  ;;  %s647_s5 = sand.u32 1, %s880_s9  }
 0x161   : > { %s648_s6 = scalar_lea.sflag [#allocation3], %s647_s5 }
 0x162   : > { %p787_p7 = pnand %p790_p4, %p955_p6 }
 0x164   : > { %p788_p8 = pneg %p787_p7 }
 0x166   : > { %875 = dma.done.wait (%p788_p8), %s648_s6, 4096  }
 0x167   : > { %877 = vsyncadd (%p788_p8), %s648_s6, 4294963200  ;;  %p12_p9 = scmp.ge.s32.totalorder %s938_s15, 4   ;;  %s1185_s9 = smov %s884_s10 }
 0x168   : > { %s1186_s10 = smov %s888_s11  ;;  %s1187_s11 = smov %s949_s18 }
 0x169   : > { %s1188_s12 = smov %s938_s15  ;;  %14 = sbr.rel (!%p12_p9) target bundleno = 3 (0x3), region = 63 }
 0x16e   :  { %654 = vsyncpa [#allocation3], 1 }
 0x16f   :  { %656 = vsyncpa [#allocation3 + $0x1], 1 }

</bundles_post_ra>
